<compile_context>
chip_gen: v7x
topology: tpu7x:2x2x1
jax: 0.10.0
libtpu: 0.0.40
codegen_flags: <defaults>
</compile_context>

<pallas_src>
import functools

import jax
import jax.numpy as jnp
from jax.experimental import pallas as pl
from jax.experimental.pallas import tpu as pltpu


def _round_up(x, m):
    return ((x + m - 1) // m) * m


# ---------------------------------------------------------------------------
# Pallas kernel: fused  logits = [user_embed | item_embed] @ [Wu^T ; Wi^T]
# ---------------------------------------------------------------------------
def _logits_kernel(x_ref, w_ref, out_ref):
    # x_ref  : [Bp, 2E]   (resident across the vocab grid; block index constant)
    # w_ref  : [2E, TV]   (one lane-dense vocab tile of the combined weights)
    # out_ref: [Bp, TV]   (f32)
    out_ref[...] = jnp.dot(
        x_ref[...], w_ref[...], preferred_element_type=jnp.float32
    )


@functools.partial(jax.jit, static_argnames=("tile_v",))
def fused_attr_logits(x, w_comb_t, *, tile_v):
    """x: [B, 2E] (compute dtype); w_comb_t: [2E, Vpad] with Vpad % tile_v == 0."""
    B, K = x.shape
    Kw, Vpad = w_comb_t.shape
    assert K == Kw and Vpad % tile_v == 0

    # Pad batch to a sublane multiple so output stores are unmasked full tiles.
    Bp = _round_up(B, 8)
    if Bp != B:
        x = jnp.pad(x, ((0, Bp - B), (0, 0)))

    grid = (Vpad // tile_v,)
    out = pl.pallas_call(
        _logits_kernel,
        out_shape=jax.ShapeDtypeStruct((Bp, Vpad), jnp.float32),
        grid_spec=pltpu.PrefetchScalarGridSpec(
            num_scalar_prefetch=0,
            grid=grid,
            in_specs=[
                pl.BlockSpec((Bp, K), lambda j: (0, 0)),       # activations, resident
                pl.BlockSpec((K, tile_v), lambda j: (0, j)),   # combined weight vocab tile
            ],
            out_specs=pl.BlockSpec((Bp, tile_v), lambda j: (0, j)),
        ),
        compiler_params=pltpu.CompilerParams(
            dimension_semantics=("parallel",),
            vmem_limit_bytes=32 << 20,  # 2E x tile_v bf16 double buffers fit easily on all gens
        ),
    )(x, w_comb_t)
    return out[:B] if Bp != B else out


# ---------------------------------------------------------------------------
# Parameter construction (mirrors f_init_weight: U(-0.1, 0.1))
# ---------------------------------------------------------------------------
def make_params(key, *, user_num, item_num, emb_size, vocab_size,
                tile_v=2048, compute_dtype=jnp.bfloat16):
    initrange = 0.1
    k1, k2, k3, k4 = jax.random.split(key, 4)
    user_embedding = jax.random.uniform(
        k1, (user_num, emb_size), jnp.float32, -initrange, initrange)
    item_embedding = jax.random.uniform(
        k2, (item_num, emb_size), jnp.float32, -initrange, initrange)
    # PyTorch nn.Linear weight layout is [out, in] = [V, E]; keep f32 copies for reference.
    w_attr_user = jax.random.uniform(
        k3, (vocab_size, emb_size), jnp.float32, -initrange, initrange)
    w_attr_item = jax.random.uniform(
        k4, (vocab_size, emb_size), jnp.float32, -initrange, initrange)

    # One-time restructuring for the kernel: transpose -> concat -> pad -> bf16.
    eff_tile_v = min(tile_v, _round_up(vocab_size, 128))
    v_pad = _round_up(vocab_size, eff_tile_v)
    w_comb_t = jnp.concatenate([w_attr_user.T, w_attr_item.T], axis=0)   # [2E, V]
    w_comb_t = jnp.pad(w_comb_t, ((0, 0), (0, v_pad - vocab_size)))
    w_comb_t = w_comb_t.astype(compute_dtype)                            # [2E, Vpad]

    return {
        "user_embedding": user_embedding,
        "item_embedding": item_embedding,
        "w_attr_user": w_attr_user,            # f32, PyTorch layout (reference only)
        "w_attr_item": w_attr_item,            # f32, PyTorch layout (reference only)
        "w_attr_combined_t": w_comb_t,         # [2E, Vpad] compute_dtype (kernel path)
        "vocab_size": vocab_size,              # python int
        "tile_v": eff_tile_v,                  # python int
    }


# ---------------------------------------------------------------------------
# Full forward (glue in plain JAX, hot path in Pallas)
# ---------------------------------------------------------------------------
def attr_network_forward(params, pos_attr_set, pos_attr_lens,
                         neg_attr_set, neg_attr_lens, neg_attr_set_num,
                         user_ids, item_ids, _unused_arg=None):
    # Embedding lookups (gather) — glue.
    user_embed = params["user_embedding"][user_ids]   # [B, E]
    item_embed = params["item_embedding"][item_ids]   # [B, E]

    # Dropout(p=0.2) is identity in eval mode.
    # TODO(synk): training-mode dropout would need an RNG-driven mask.

    # Mask: PyTorch uses max_len = pos_attr_lens.max() (dynamic); JAX needs a
    # static bound, so use the padded sequence length of pos_attr_set.
    max_len = pos_attr_set.shape[1]
    mask = ~(jnp.arange(max_len)[None, :] < pos_attr_lens[:, None])      # [B, L] bool

    # Hot path: single fused [B, 2E] x [2E, Vpad] contraction in Pallas.
    w_comb_t = params["w_attr_combined_t"]
    x = jnp.concatenate([user_embed, item_embed], axis=1).astype(w_comb_t.dtype)  # [B, 2E]
    logits_pad = fused_attr_logits(x, w_comb_t, tile_v=params["tile_v"])
    logits = logits_pad[:, : params["vocab_size"]]
    return logits, None, mask


# ---------------------------------------------------------------------------
# Pure-JAX reference for validation (f32, PyTorch layout)
# ---------------------------------------------------------------------------
def attr_network_forward_ref(params, pos_attr_set, pos_attr_lens,
                             neg_attr_set, neg_attr_lens, neg_attr_set_num,
                             user_ids, item_ids, _unused_arg=None):
    user_embed = params["user_embedding"][user_ids]
    item_embed = params["item_embedding"][item_ids]
    max_len = pos_attr_set.shape[1]
    mask = ~(jnp.arange(max_len)[None, :] < pos_attr_lens[:, None])
    logits = (user_embed @ params["w_attr_user"].T
              + item_embed @ params["w_attr_item"].T)
    return logits, None, mask


if __name__ == "__main__":
    # Small synthetic config consistent with the module:
    #   vocab_size=128, user_num=16, item_num=16,
    #   attr_emb_size = user_emb_size = item_emb_size = 32
    VOCAB, USERS, ITEMS, EMB = 128, 16, 16, 32
    B, SEQ = 8, 8

    key = jax.random.PRNGKey(0)
    kp, k_uid, k_iid, k_len, k_set = jax.random.split(key, 5)

    params = make_params(kp, user_num=USERS, item_num=ITEMS,
                         emb_size=EMB, vocab_size=VOCAB)

    user_ids = jax.random.randint(k_uid, (B,), 0, USERS)
    item_ids = jax.random.randint(k_iid, (B,), 0, ITEMS)
    pos_attr_lens = jax.random.randint(k_len, (B,), 1, SEQ + 1)
    pos_attr_set = jax.random.randint(k_set, (B, SEQ), 0, VOCAB)
    # Negative-set args are unused by forward; pass placeholders.
    neg_attr_set = jnp.zeros((B, SEQ), jnp.int32)
    neg_attr_lens = jnp.ones((B,), jnp.int32)
    neg_attr_set_num = jnp.ones((B,), jnp.int32)

    logits, none_out, mask = attr_network_forward(
        params, pos_attr_set, pos_attr_lens, neg_attr_set, neg_attr_lens,
        neg_attr_set_num, user_ids, item_ids, None)
    jax.block_until_ready(logits)
    jax.block_until_ready(mask)

    # Validate against pure-JAX f32 reference (kernel matmul runs in bf16 -> f32 acc).
    ref_logits, _, ref_mask = attr_network_forward_ref(
        params, pos_attr_set, pos_attr_lens, neg_attr_set, neg_attr_lens,
        neg_attr_set_num, user_ids, item_ids, None)
    assert logits.shape == (B, VOCAB) and logits.dtype == jnp.float32
    assert mask.shape == (B, SEQ) and mask.dtype == jnp.bool_
    assert none_out is None
    assert jnp.allclose(logits, ref_logits, atol=2e-2, rtol=2e-2), (
        float(jnp.max(jnp.abs(logits - ref_logits))))
    assert jnp.array_equal(mask, ref_mask)

    # Tight check: kernel vs XLA doing the identical bf16 contraction.
    x_bf16 = jnp.concatenate(
        [params["user_embedding"][user_ids], params["item_embedding"][item_ids]],
        axis=1).astype(params["w_attr_combined_t"].dtype)
    same_dtype_ref = jnp.dot(x_bf16, params["w_attr_combined_t"],
                             preferred_element_type=jnp.float32)[:, :VOCAB]
    assert jnp.allclose(logits, same_dtype_ref, atol=1e-5, rtol=1e-5)

    print("KERNEL_OK")
</pallas_src>

<mosaic_0001>
module attributes {stable_mosaic.version = 11 : i64} {
  func.func @_logits_kernel(%arg0: i32, %arg1: memref<8x64xbf16, #tpu.memory_space<vmem>>, %arg2: memref<64x128xbf16, #tpu.memory_space<vmem>>, %arg3: memref<8x128xf32, #tpu.memory_space<vmem>>) attributes {dimension_semantics = [#tpu.dimension_semantics<parallel>], iteration_bounds = array<i64: 1>, scalar_prefetch = 0 : i64, scratch_operands = 0 : i64, tpu.core_type = #tpu.core_type<tc>, window_params = [{pipeline_mode = #tpu.pipeline_mode<synchronous>, transform_indices = @transform_0, window_bounds = array<i64: 8, 64>}, {transform_indices = @transform_1, window_bounds = array<i64: 64, 128>}, {transform_indices = @transform_2, window_bounds = array<i64: 8, 128>}]} {
    %c0 = arith.constant 0 : index
    %c0_0 = arith.constant 0 : index
    %0 = vector.load %arg1[%c0, %c0_0] : memref<8x64xbf16, #tpu.memory_space<vmem>>, vector<8x64xbf16>
    %c0_1 = arith.constant 0 : index
    %c0_2 = arith.constant 0 : index
    %1 = vector.load %arg2[%c0_1, %c0_2] : memref<64x128xbf16, #tpu.memory_space<vmem>>, vector<64x128xbf16>
    %cst = arith.constant dense<0.000000e+00> : vector<8x128xf32>
    %2 = tpu.matmul %0, %1, %cst {dimension_numbers = #tpu.dot_dimension_numbers<[1], [0], [0], [1], [0, 0, 1, 1], [], []>} : vector<8x64xbf16>, vector<64x128xbf16>, vector<8x128xf32> -> vector<8x128xf32>
    %c0_3 = arith.constant 0 : index
    %c0_4 = arith.constant 0 : index
    %3 = vector.load %arg3[%c0_3, %c0_4] : memref<8x128xf32, #tpu.memory_space<vmem>>, vector<8x128xf32>
    tpu.vector_store %arg3[%c0_3, %c0_4], %2 {strides = array<i32>} : memref<8x128xf32, #tpu.memory_space<vmem>>, vector<8x128xf32>,
    return
  }
  func.func @transform_0(%arg0: i32) -> (i32, i32) {
    %c0_i32 = arith.constant 0 : i32
    %c0_i32_0 = arith.constant 0 : i32
    %c0_i32_1 = arith.constant 0 : i32
    return %c0_i32, %c0_i32_0 : i32, i32
  }
  func.func @transform_1(%arg0: i32) -> (i32, i32) {
    %c0_i32 = arith.constant 0 : i32
    %c0_i32_0 = arith.constant 0 : i32
    return %c0_i32, %arg0 : i32, i32
  }
  func.func @transform_2(%arg0: i32) -> (i32, i32) {
    %c0_i32 = arith.constant 0 : i32
    %c0_i32_0 = arith.constant 0 : i32
    return %c0_i32, %arg0 : i32, i32
  }
}

</mosaic_0001>

<bundles_post_ra>
// kernel: fused_attr_logits.1
= control target key start
LH: loop header
LB: loop body
LE: loop exit
PB: predicated region body
PF: predicated region fallthrough
CT: control target
= control target key end

     0   :  { %7 = vsyncpa [#allocation3], 0  ;;  %s303_s0 = inlined_call_operand.hbm [shape: bf16[8,64], index: 0, kind: input, shape index: {}]   ;;  %s304_s1 = inlined_call_operand.hbm [shape: bf16[64,128], index: 1, kind: input, shape index: {}]   ;;  %s305_s2 = inlined_call_operand.hbm [shape: f32[8,128], index: 2, kind: output, shape index: {}]  }
   0x1   :  { %8 = vsyncpa [#allocation6], 0 }
   0x2   :  { %9 = vsyncpa [#allocation4], 0  ;;  %s238_s9 = smov [#allocation2]   ;;  %s239_s11 = smov [#allocation5]  }
   0x3   :  { %s16_s10 = sshll.u32 %s238_s9, 4  ;;  %s25_s12 = sshll.u32 %s239_s11, 4  ;;  %s17_s10 = int_to_ptr.vmem [resolvable:$true] %s16_s10  ;;  %s260_s12 = int_to_ptr.vmem [resolvable:$true] %s25_s12 }
   0x4   :  { %s166_s15 = scalar_lea.hbm %s303_s0, 64 }
   0x5   :  { %p167_p0 = scmp.ne.s32.totalorder %s303_s0, %s166_s15  ;;  %p170_p1 = scmp.lt.u32.totalorder %s166_s15, %s303_s0 }
   0x7   :  { %p172_p2 = pnand %p170_p1, %p167_p0 }
   0x9   :  { %175 = shalt.err (!%p172_p2)
}
   0xa   :  { %s176_s20 = scalar_lea.vmem %s17_s10, 64  ;;  %p181_p4 = scmp.lt.s32.totalorder %s17_s10, %s17_s10 }
   0xb   :  { %p177_p3 = scmp.ne.s32.totalorder %s17_s10, %s176_s20  ;;  %p182_p5 = scmp.lt.s32.totalorder %s176_s20, %s176_s20 }
   0xd   :  { %p183_p6 = por %p182_p5, %p181_p4 }
   0xf   :  { %p184_p7 = pnand %p183_p6, %p177_p3 }
  0x11   :  { %187 = shalt.err (!%p184_p7)
}
  0x12   :  { %19 = dma.hbm_to_vmem [thread:$0]  %s303_s0, 64, %s17_s10, [#allocation3]  }
  0x13   :  { %s188_s25 = scalar_lea.hbm %s304_s1, 512 }
  0x14   :  { %p189_p8 = scmp.ne.s32.totalorder %s304_s1, %s188_s25  ;;  %p192_p9 = scmp.lt.u32.totalorder %s188_s25, %s304_s1 }
  0x16   :  { %p194_p10 = pnand %p192_p9, %p189_p8 }
  0x18   :  { %197 = shalt.err (!%p194_p10)
}
  0x19   :  { %s198_s30 = scalar_lea.vmem %s260_s12, 512  ;;  %p203_p12 = scmp.lt.s32.totalorder %s260_s12, %s260_s12 }
  0x1a   :  { %p199_p11 = scmp.ne.s32.totalorder %s260_s12, %s198_s30  ;;  %p204_p13 = scmp.lt.s32.totalorder %s198_s30, %s198_s30 }
  0x1c   :  { %p205_p0 = por %p204_p13, %p203_p12 }
  0x1e   :  { %p206_p1 = pnand %p205_p0, %p199_p11 }
  0x20   :  { %209 = shalt.err (!%p206_p1)
}
  0x21   :  { %s240_s0 = smov 64   ;;  %s241_s3 = smov 4  }
  0x22   :  { %31 = dma.hbm_to_vmem [thread:$0]  %s304_s1, 512, %s260_s12, [#allocation6], %s240_s0, %s240_s0, %s241_s3  }
  0x23   :  { %232 = dma.done.wait [#allocation3], 64  }
  0x24   :  { %233 = vsyncadd [#allocation3], 4294967232 }
  0x25   :  { %234 = dma.done.wait [#allocation6], 512  }
  0x26   :  { %235 = vsyncadd [#allocation6], 4294966784  ;;  %v242_v0 = vmov 0.0   ;;  %vm243_vm0 = vmmov 0   ;;  %v162_v1 = vld [vmem:[#allocation5] sm:$0xff]   ;;  %v163_v2 = vld [vmem:[#allocation5 + $0x8] sm:$0xff]  }
  0x27   :  { %143 = vmatprep.subr.bf16.mxu0 %v242_v0  ;;  %151 = vmatprep.mubr.msk.bf16.mxu0 %vm243_vm0, %v242_v0  ;;  %v164_v3 = vld [vmem:[#allocation5 + $0x10] sm:$0xff]   ;;  %v165_v4 = vld [vmem:[#allocation5 + $0x18] sm:$0xff]   ;;  %vm72_vm1 = vcmask 523264   ;;  %s244_s1 = smov [#allocation7]  }
  0x28   :  { %144 = vmatpush3.bf16.msra.mxu0 %v162_v1  ;;  %v39_v5 = vld [vmem:[#allocation2] sm:$0xf]  ;;  %s123_s6 = sshll.u32 %s244_s1, 4  ;;  %s124_s6 = int_to_ptr.vmem [resolvable:$true] %s123_s6 }
  0x29   :  { %145 = vmatprep.subr.bf16.mxu0 %v242_v0  ;;  %s210_s7 = scalar_lea.vmem %s124_s6, 128  ;;  %p215_p3 = scmp.lt.s32.totalorder %s124_s6, %s124_s6 }
  0x2a   :  { %p211_p2 = scmp.ne.s32.totalorder %s124_s6, %s210_s7  ;;  %p216_p4 = scmp.lt.s32.totalorder %s210_s7, %s210_s7 }
  0x2c   :  { %146 = vmatpush3.bf16.msra.mxu0 %v163_v2  ;;  %p217_p5 = por %p216_p4, %p215_p3 }
  0x2d   :  { %147 = vmatprep.subr.bf16.mxu0 %v242_v0 }
  0x2e   :  { %p218_p6 = pnand %p217_p5, %p211_p2 }
  0x30   :  { %148 = vmatpush3.bf16.msra.mxu0 %v164_v3 }
  0x31   :  { %149 = vmatprep.subr.bf16.mxu0 %v242_v0 }
  0x34   :  { %150 = vmatpush3.bf16.msra.mxu0 %v165_v4 }
  0x37   :  { %152 = vmatmul.mubr.msk.bf16.vlgmr.msra.gmra.mrb[0].mxu0 %vm72_vm1, %v39_v5 }
 0x10a   :  { %v110_v6 = vpop.f32.mrb[0].mxu0 }
 0x10b   :  { %116 = vst [vmem:[#allocation7] sm:$0xff] %v110_v6  ;;  %v153_v7 = vpop.f32.mrb[1].mxu0 }
 0x10c   :  { %v113_v8 = vpop.f32.mrb[2].mxu0 }
 0x10d   :  { %221 = shalt.err (!%p218_p6)
}
 0x10e   :  { %s222_s10 = scalar_lea.hbm %s305_s2, 128 }
 0x10f   :  { %p223_p7 = scmp.ne.s32.totalorder %s305_s2, %s222_s10  ;;  %p226_p8 = scmp.lt.u32.totalorder %s222_s10, %s305_s2 }
 0x111   :  { %p228_p9 = pnand %p226_p8, %p223_p7 }
 0x113   :  { %231 = shalt.err (!%p228_p9)
}
 0x114   :  { %126 = dma.vmem_to_hbm [thread:$0]  %s124_s6, 128, %s305_s2, [#allocation4]   ;;  %v154_v9 = vpop.f32.mrb[3].mxu0 }
 0x115   :  { %236 = dma.done.wait [#allocation4], 128  }
 0x116   :  { %237 = vsyncadd [#allocation4], 4294967168 }
 0x117   :  { %130 = vsyncpa [#allocation3], 1 }
 0x118   :  { %131 = vsyncpa [#allocation6], 1 }
 0x119   :  { %132 = vsyncpa [#allocation4], 1 }

</bundles_post_ra>
